<compile_context>
chip_gen: v6e
topology: v6e:2x2x1
jax: 0.10.0
libtpu: 0.0.40
codegen_flags: <defaults>
</compile_context>

<pallas_src>
import jax
import jax.numpy as jnp
from jax.experimental import pallas as pl
from jax.experimental.pallas import tpu as pltpu

SUBLANE = 8


def _round_up(n, m):
    return (n + m - 1) // m * m


def _num_tensorcores():
    """2 TensorCores per chip on v7x; 1 on v5e/v6e (default)."""
    try:
        kind = jax.devices()[0].device_kind.lower()
    except Exception:
        return 1
    return 2 if ("v7" in kind or "7x" in kind) else 1


def mlp_kernel(x_ref, w1_ref, b1_ref, w2_ref, b2_ref, o_ref):
    # x_ref:  (TB, D_in)    f32  VMEM (streamed per grid step)
    # w1_ref: (D_in, H)     bf16 VMEM (resident across steps)
    # b1_ref: (1, H)        f32  VMEM (resident)
    # w2_ref: (H, D_out)    bf16 VMEM (resident)
    # b2_ref: (1, D_out)    f32  VMEM (resident)
    # o_ref:  (TB, D_out)   f32  VMEM (streamed per grid step)
    x = x_ref[...].astype(jnp.bfloat16)  # in-kernel cast: no wrapper pass over x
    h = jnp.dot(x, w1_ref[...], preferred_element_type=jnp.float32)
    h = jnp.maximum(h + b1_ref[...], 0.0)  # bias + ReLU on the f32 accumulator
    # Dropout(p=0.0) == identity at inference; folded away.
    # TODO(synk): training-mode dropout (p>0) would use pltpu.prng_seed + prng_random_bits.
    y = jnp.dot(h.astype(jnp.bfloat16), w2_ref[...],
                preferred_element_type=jnp.float32)
    o_ref[...] = (y + b2_ref[...]).astype(o_ref.dtype)


def prepare_mlp_params(w1, b1, w2, b2):
    """One-time weight prep (do this once, outside the per-call path / jit).

    Weights stored (in, out) so the kernel computes x @ W + b; bf16 for the MXU,
    biases stay f32 (added on the f32 accumulator).
    """
    return (
        jnp.asarray(w1, jnp.bfloat16),
        jnp.asarray(b1, jnp.float32).reshape(1, -1),
        jnp.asarray(w2, jnp.bfloat16),
        jnp.asarray(b2, jnp.float32).reshape(1, -1),
    )


def mlp_forward(x, params, *, num_cores=None):
    """x: (B, D_in) f32; params from prepare_mlp_params(). Returns (B, D_out) f32."""
    w1, b1, w2, b2 = params
    B, D_in = x.shape
    H = w1.shape[1]
    D_out = w2.shape[1]

    if num_cores is None:
        num_cores = _num_tensorcores()

    # Batch tiling only: 1 tile per TensorCore (grid=(1,) on v5e/v6e, (2,) on v7x).
    TB = _round_up(max(1, -(-_round_up(B, SUBLANE) // num_cores)), SUBLANE)
    B_p = _round_up(B, TB)

    x_p = x if B_p == B else jnp.pad(x, ((0, B_p - B), (0, 0)))

    out_p = pl.pallas_call(
        mlp_kernel,
        out_shape=jax.ShapeDtypeStruct((B_p, D_out), jnp.float32),
        grid=(B_p // TB,),
        in_specs=[
            pl.BlockSpec((TB, D_in), lambda i: (i, 0)),     # x: streamed, unpadded lanes
            pl.BlockSpec((D_in, H), lambda i: (0, 0)),      # w1: resident
            pl.BlockSpec((1, H), lambda i: (0, 0)),         # b1: resident
            pl.BlockSpec((H, D_out), lambda i: (0, 0)),     # w2: resident
            pl.BlockSpec((1, D_out), lambda i: (0, 0)),     # b2: resident
        ],
        out_specs=pl.BlockSpec((TB, D_out), lambda i: (i, 0)),  # unpadded lane axis
        compiler_params=pltpu.CompilerParams(
            dimension_semantics=("parallel",),  # shards the 2-step grid on v7x
        ),
    )(x_p, w1, b1, w2, b2)

    # Keep the batch slice: padded rows hold ReLU(b1)@w2 + b2 garbage.
    return out_p if B_p == B else out_p[:B]


if __name__ == "__main__":
    # Shapes consistent with the module: batch=256, input_dim=16, hidden=32, out=8.
    B, D_in, H, D_out = 256, 16, 32, 8

    key = jax.random.PRNGKey(0)
    kx, kw1, kb1, kw2, kb2 = jax.random.split(key, 5)

    x = jax.random.normal(kx, (B, D_in), dtype=jnp.float32)

    # nn.Linear-style uniform(-1/sqrt(fan_in), 1/sqrt(fan_in)) init.
    bound1 = 1.0 / jnp.sqrt(jnp.float32(D_in))
    bound2 = 1.0 / jnp.sqrt(jnp.float32(H))
    w1 = jax.random.uniform(kw1, (D_in, H), jnp.float32, -bound1, bound1)
    b1 = jax.random.uniform(kb1, (H,), jnp.float32, -bound1, bound1)
    w2 = jax.random.uniform(kw2, (H, D_out), jnp.float32, -bound2, bound2)
    b2 = jax.random.uniform(kb2, (D_out,), jnp.float32, -bound2, bound2)

    params = prepare_mlp_params(w1, b1, w2, b2)  # one-time cast, outside hot path
    out = jax.block_until_ready(mlp_forward(x, params))

    # Reference matching the kernel's bf16-input / f32-accumulate numerics.
    xb = x.astype(jnp.bfloat16).astype(jnp.float32)
    w1b = w1.astype(jnp.bfloat16).astype(jnp.float32)
    w2b = w2.astype(jnp.bfloat16).astype(jnp.float32)
    h_ref = jnp.maximum(xb @ w1b + b1, 0.0)
    ref = h_ref.astype(jnp.bfloat16).astype(jnp.float32) @ w2b + b2

    assert out.shape == (B, D_out)
    assert jnp.allclose(out, ref, atol=1e-2, rtol=1e-2)

    # Sanity check vs the full-f32 reference (looser tolerance for bf16 rounding).
    ref_f32 = jnp.maximum(x @ w1 + b1, 0.0) @ w2 + b2
    assert jnp.allclose(out, ref_f32, atol=5e-2, rtol=5e-2)

    print("KERNEL_OK")
</pallas_src>

<mosaic_0001>
module attributes {stable_mosaic.version = 11 : i64} {
  func.func @mlp_kernel(%arg0: i32, %arg1: memref<256x16xf32, #tpu.memory_space<vmem>>, %arg2: memref<16x32xbf16, #tpu.memory_space<vmem>>, %arg3: memref<1x32xf32, #tpu.memory_space<vmem>>, %arg4: memref<32x8xbf16, #tpu.memory_space<vmem>>, %arg5: memref<1x8xf32, #tpu.memory_space<vmem>>, %arg6: memref<256x8xf32, #tpu.memory_space<vmem>>) attributes {dimension_semantics = [#tpu.dimension_semantics<parallel>], iteration_bounds = array<i64: 1>, scalar_prefetch = 0 : i64, scratch_operands = 0 : i64, tpu.core_type = #tpu.core_type<tc>, window_params = [{transform_indices = @transform_0, window_bounds = array<i64: 256, 16>}, {pipeline_mode = #tpu.pipeline_mode<synchronous>, transform_indices = @transform_1, window_bounds = array<i64: 16, 32>}, {pipeline_mode = #tpu.pipeline_mode<synchronous>, transform_indices = @transform_2, window_bounds = array<i64: 1, 32>}, {pipeline_mode = #tpu.pipeline_mode<synchronous>, transform_indices = @transform_3, window_bounds = array<i64: 32, 8>}, {pipeline_mode = #tpu.pipeline_mode<synchronous>, transform_indices = @transform_4, window_bounds = array<i64: 1, 8>}, {transform_indices = @transform_5, window_bounds = array<i64: 256, 8>}]} {
    %c0 = arith.constant 0 : index
    %c0_0 = arith.constant 0 : index
    %0 = vector.load %arg1[%c0, %c0_0] : memref<256x16xf32, #tpu.memory_space<vmem>>, vector<256x16xf32>
    %1 = arith.truncf %0 : vector<256x16xf32> to vector<256x16xbf16>
    %c0_1 = arith.constant 0 : index
    %c0_2 = arith.constant 0 : index
    %2 = vector.load %arg2[%c0_1, %c0_2] : memref<16x32xbf16, #tpu.memory_space<vmem>>, vector<16x32xbf16>
    %cst = arith.constant dense<0.000000e+00> : vector<256x32xf32>
    %3 = tpu.matmul %1, %2, %cst {dimension_numbers = #tpu.dot_dimension_numbers<[1], [0], [0], [1], [0, 0, 1, 1], [], []>} : vector<256x16xbf16>, vector<16x32xbf16>, vector<256x32xf32> -> vector<256x32xf32>
    %c0_3 = arith.constant 0 : index
    %c0_4 = arith.constant 0 : index
    %4 = vector.load %arg3[%c0_3, %c0_4] : memref<1x32xf32, #tpu.memory_space<vmem>>, vector<1x32xf32>
    %5 = vector.broadcast %4 : vector<1x32xf32> to vector<256x32xf32>
    %6 = arith.addf %3, %5 : vector<256x32xf32>
    %cst_5 = arith.constant 0.000000e+00 : f32
    %7 = vector.broadcast %cst_5 : f32 to vector<256x32xf32>
    %8 = arith.maximumf %6, %7 : vector<256x32xf32>
    %9 = arith.truncf %8 : vector<256x32xf32> to vector<256x32xbf16>
    %c0_6 = arith.constant 0 : index
    %c0_7 = arith.constant 0 : index
    %10 = vector.load %arg4[%c0_6, %c0_7] : memref<32x8xbf16, #tpu.memory_space<vmem>>, vector<32x8xbf16>
    %cst_8 = arith.constant dense<0.000000e+00> : vector<256x8xf32>
    %11 = tpu.matmul %9, %10, %cst_8 {dimension_numbers = #tpu.dot_dimension_numbers<[1], [0], [0], [1], [0, 0, 1, 1], [], []>} : vector<256x32xbf16>, vector<32x8xbf16>, vector<256x8xf32> -> vector<256x8xf32>
    %c0_9 = arith.constant 0 : index
    %c0_10 = arith.constant 0 : index
    %12 = vector.load %arg5[%c0_9, %c0_10] : memref<1x8xf32, #tpu.memory_space<vmem>>, vector<1x8xf32>
    %13 = vector.broadcast %12 : vector<1x8xf32> to vector<256x8xf32>
    %14 = arith.addf %11, %13 : vector<256x8xf32>
    %c0_11 = arith.constant 0 : index
    %c0_12 = arith.constant 0 : index
    %15 = vector.load %arg6[%c0_11, %c0_12] : memref<256x8xf32, #tpu.memory_space<vmem>>, vector<256x8xf32>
    tpu.vector_store %arg6[%c0_11, %c0_12], %14 {strides = array<i32>} : memref<256x8xf32, #tpu.memory_space<vmem>>, vector<256x8xf32>,
    return
  }
  func.func @transform_0(%arg0: i32) -> (i32, i32) {
    %c0_i32 = arith.constant 0 : i32
    %c0_i32_0 = arith.constant 0 : i32
    return %arg0, %c0_i32 : i32, i32
  }
  func.func @transform_1(%arg0: i32) -> (i32, i32) {
    %c0_i32 = arith.constant 0 : i32
    %c0_i32_0 = arith.constant 0 : i32
    %c0_i32_1 = arith.constant 0 : i32
    return %c0_i32, %c0_i32_0 : i32, i32
  }
  func.func @transform_2(%arg0: i32) -> (i32, i32) {
    %c0_i32 = arith.constant 0 : i32
    %c0_i32_0 = arith.constant 0 : i32
    %c0_i32_1 = arith.constant 0 : i32
    return %c0_i32, %c0_i32_0 : i32, i32
  }
  func.func @transform_3(%arg0: i32) -> (i32, i32) {
    %c0_i32 = arith.constant 0 : i32
    %c0_i32_0 = arith.constant 0 : i32
    %c0_i32_1 = arith.constant 0 : i32
    return %c0_i32, %c0_i32_0 : i32, i32
  }
  func.func @transform_4(%arg0: i32) -> (i32, i32) {
    %c0_i32 = arith.constant 0 : i32
    %c0_i32_0 = arith.constant 0 : i32
    %c0_i32_1 = arith.constant 0 : i32
    return %c0_i32, %c0_i32_0 : i32, i32
  }
  func.func @transform_5(%arg0: i32) -> (i32, i32) {
    %c0_i32 = arith.constant 0 : i32
    %c0_i32_0 = arith.constant 0 : i32
    return %arg0, %c0_i32 : i32, i32
  }
}

</mosaic_0001>

<bundles_post_ra>
// kernel: tpu_custom_call.1
= control target key start
LH: loop header
LB: loop body
LE: loop exit
PB: predicated region body
PF: predicated region fallthrough
CT: control target
= control target key end

     0   :  { %vm84_vm0 = vcmask 130048   ;;  %vm365_vm1 = vcmask 261120   ;;  %vm575_vm2 = vcmask 64512   ;;  %s1126_s1 = inlined_call_operand.vmem [shape: bf16[16,32], index: 1, kind: input, shape index: {}]   ;;  %s1127_s0 = inlined_call_operand.vmem [shape: f32[256,16], index: 0, kind: input, shape index: {}]   ;;  %s1128_s3 = inlined_call_operand.vmem [shape: bf16[32,8], index: 3, kind: input, shape index: {}]   ;;  %s1129_s2 = inlined_call_operand.vmem [shape: f32[1,32], index: 2, kind: input, shape index: {}]   ;;  %s1130_s4 = inlined_call_operand.vmem [shape: f32[1,8], index: 4, kind: input, shape index: {}]   ;;  %s1131_s5 = inlined_call_operand.vmem [shape: f32[256,8], index: 5, kind: output, shape index: {}]  }
   0x1   :  { %v754_v0 = vld [vmem:[%s1126_s1] sm:$0xff]   ;;  %v22_v2 = vld [vmem:[%s1127_s0 + $0x8] sm:$0xff]  ;;  %v23_v3 = vld [vmem:[%s1127_s0 + $0x10] sm:$0xff] }
   0x2   :  { %v21_v1 = vld [vmem:[%s1127_s0] sm:$0xff]  ;;  %684 = vmatprep.subr.bf16.mxu0 %v754_v0  ;;  %v24_v5 = vld [vmem:[%s1127_s0 + $0x18] sm:$0xff]  ;;  %v26_v7 = vld [vmem:[%s1127_s0 + $0x28] sm:$0xff] }
   0x3   :  { %v53_v4 = vpack.c.bf16 %v22_v2, %v21_v1  ;;  %v25_v6 = vld [vmem:[%s1127_s0 + $0x20] sm:$0xff]  ;;  %685 = vmatpush3.bf16.msra.mxu0 %v754_v0  ;;  %v54_v8 = vpack.c.bf16 %v24_v5, %v23_v3  ;;  %v27_v10 = vld [vmem:[%s1127_s0 + $0x30] sm:$0xff]  ;;  %v28_v11 = vld [vmem:[%s1127_s0 + $0x38] sm:$0xff] }
   0x4   :  { %v55_v9 = vpack.c.bf16 %v26_v7, %v25_v6  ;;  %v29_v12 = vld [vmem:[%s1127_s0 + $0x40] sm:$0xff]  ;;  %v30_v13 = vld [vmem:[%s1127_s0 + $0x48] sm:$0xff]  ;;  %v56_v14 = vpack.c.bf16 %v28_v11, %v27_v10  ;;  %v31_v16 = vld [vmem:[%s1127_s0 + $0x50] sm:$0xff] }
   0x5   :  { %686 = vmatprep.mubr.msk.bf16.mxu0 %vm84_vm0, %v53_v4  ;;  %v57_v15 = vpack.c.bf16 %v30_v13, %v29_v12  ;;  %v32_v17 = vld [vmem:[%s1127_s0 + $0x58] sm:$0xff]  ;;  %v33_v18 = vld [vmem:[%s1127_s0 + $0x60] sm:$0xff]  ;;  %v34_v19 = vld [vmem:[%s1127_s0 + $0x68] sm:$0xff] }
   0x6   :  { %687 = vmatmul.mubr.msk.bf16.vlgmr.msra.gmra.mxu0 %vm84_vm0, %v54_v8  ;;  %v58_v20 = vpack.c.bf16 %v32_v17, %v31_v16  ;;  %v59_v21 = vpack.c.bf16 %v34_v19, %v33_v18  ;;  %v35_v22 = vld [vmem:[%s1127_s0 + $0x70] sm:$0xff]  ;;  %v36_v23 = vld [vmem:[%s1127_s0 + $0x78] sm:$0xff]  ;;  %v37_v24 = vld [vmem:[%s1127_s0 + $0x80] sm:$0xff] }
   0x7   :  { %690 = vmatprep.mubr.msk.bf16.mxu0 %vm84_vm0, %v55_v9  ;;  %v38_v25 = vld [vmem:[%s1127_s0 + $0x88] sm:$0xff]  ;;  %v60_v26 = vpack.c.bf16 %v36_v23, %v35_v22  ;;  %v39_v28 = vld [vmem:[%s1127_s0 + $0x90] sm:$0xff]  ;;  %v40_v29 = vld [vmem:[%s1127_s0 + $0x98] sm:$0xff] }
   0x8   :  { %v61_v27 = vpack.c.bf16 %v38_v25, %v37_v24  ;;  %v41_v30 = vld [vmem:[%s1127_s0 + $0xa0] sm:$0xff]  ;;  %v42_v31 = vld [vmem:[%s1127_s0 + $0xa8] sm:$0xff]  ;;  %v62_v32 = vpack.c.bf16 %v40_v29, %v39_v28  ;;  %v43_v34 = vld [vmem:[%s1127_s0 + $0xb0] sm:$0xff] }
   0x9   :  { %v63_v33 = vpack.c.bf16 %v42_v31, %v41_v30  ;;  %v44_v35 = vld [vmem:[%s1127_s0 + $0xb8] sm:$0xff]  ;;  %v45_v36 = vld [vmem:[%s1127_s0 + $0xc0] sm:$0xff]  ;;  %v46_v37 = vld [vmem:[%s1127_s0 + $0xc8] sm:$0xff] }
   0xa   :  { %v64_v38 = vpack.c.bf16 %v44_v35, %v43_v34  ;;  %v65_v39 = vpack.c.bf16 %v46_v37, %v45_v36  ;;  %v47_v40 = vld [vmem:[%s1127_s0 + $0xd0] sm:$0xff]  ;;  %v48_v41 = vld [vmem:[%s1127_s0 + $0xd8] sm:$0xff]  ;;  %v49_v42 = vld [vmem:[%s1127_s0 + $0xe0] sm:$0xff] }
   0xb   :  { %v50_v43 = vld [vmem:[%s1127_s0 + $0xe8] sm:$0xff]  ;;  %v66_v44 = vpack.c.bf16 %v48_v41, %v47_v40  ;;  %v51_v46 = vld [vmem:[%s1127_s0 + $0xf0] sm:$0xff]  ;;  %v52_v47 = vld [vmem:[%s1127_s0 + $0xf8] sm:$0xff] }
   0xc   :  { %v67_v45 = vpack.c.bf16 %v50_v43, %v49_v42  ;;  %v68_v48 = vpack.c.bf16 %v52_v47, %v51_v46  ;;  %v755_v49 = vld [vmem:[%s1128_s3 + $0x8] sm:$0xff]   ;;  %v756_v50 = vld [vmem:[%s1128_s3] sm:$0xff]  }
   0xd   :  { %718 = vmatprep.subr.bf16.mxu1 %v755_v49  ;;  %v911_v53 = vld [vmem:[%s1129_s2] ss:$0 sm:$0xff] }
   0xe   :  { %691 = vmatmul.mubr.msk.bf16.gmra.mxu0 %vm84_vm0, %v56_v14  ;;  %719 = vmatpush3.bf16.msra.mxu1 %v755_v49 }
   0xf   :  { %694 = vmatprep.mubr.msk.bf16.mxu0 %vm84_vm0, %v57_v15  ;;  %720 = vmatprep.subr.bf16.mxu1 %v756_v50 }
  0x12   :  { %721 = vmatpush3.bf16.msra.mxu1 %v756_v50 }
  0x16   :  { %695 = vmatmul.mubr.msk.bf16.gmra.mxu0 %vm84_vm0, %v58_v20 }
  0x17   :  { %698 = vmatprep.mubr.msk.bf16.mxu0 %vm84_vm0, %v59_v21 }
  0x1e   :  { %699 = vmatmul.mubr.msk.bf16.gmra.mxu0 %vm84_vm0, %v60_v26 }
  0x1f   :  { %702 = vmatprep.mubr.msk.bf16.mxu0 %vm84_vm0, %v61_v27 }
  0x26   :  { %703 = vmatmul.mubr.msk.bf16.gmra.mxu0 %vm84_vm0, %v62_v32 }
  0x27   :  { %706 = vmatprep.mubr.msk.bf16.mxu0 %vm84_vm0, %v63_v33 }
  0x2e   :  { %707 = vmatmul.mubr.msk.bf16.gmra.mxu0 %vm84_vm0, %v64_v38 }
  0x2f   :  { %710 = vmatprep.mubr.msk.bf16.mxu0 %vm84_vm0, %v65_v39 }
  0x36   :  { %711 = vmatmul.mubr.msk.bf16.gmra.mxu0 %vm84_vm0, %v66_v44 }
  0x37   :  { %714 = vmatprep.mubr.msk.bf16.mxu0 %vm84_vm0, %v67_v45 }
  0x3e   :  { %715 = vmatmul.mubr.msk.bf16.gmra.mxu0 %vm84_vm0, %v68_v48 }
  0xc6   :  { %v688_v51 = vpop.f32.mrf.mxu0 }
  0xc7   :  { %v176_v57 = vadd.f32 %v688_v51, %v911_v53 }
  0xc8   :  { %v167_v52 = vpop.f32.mrf.mxu0 }
  0xc9   :  { %v168_v55 = vadd.f32 %v911_v53, %v167_v52  ;;  %v296_v0 = vmax.f32 %v176_v57, 0.0 }
  0xca   :  { %v689_v54 = vpop.f32.mrf.mxu0 }
  0xcb   :  { %v179_v56 = vadd.f32 %v689_v54, %v911_v53  ;;  %v294_v62 = vmax.f32 %v168_v55, 0.0 }
  0xcc   :  { %v170_v58 = vpop.f32.mrf.mxu0 }
  0xcd   :  { %v171_v59 = vadd.f32 %v911_v53, %v170_v58  ;;  %v297_v60 = vmax.f32 %v179_v56, 0.0 }
  0xce   :  { %v692_v61 = vpop.f32.mrf.mxu0 }
  0xcf   :  { %v295_v63 = vmax.f32 %v171_v59, 0.0  ;;  %v327_v3 = vpack.c.bf16 %v297_v60, %v296_v0  ;;  %v192_v7 = vadd.f32 %v692_v61, %v911_v53 }
  0xd0   :  { %v183_v1 = vpop.f32.mrf.mxu0 }
  0xd1   :  { %v326_v2 = vpack.c.bf16 %v295_v63, %v294_v62  ;;  %v184_v5 = vadd.f32 %v911_v53, %v183_v1  ;;  %v300_v14 = vmax.f32 %v192_v7, 0.0 }
  0xd2   :  { %v693_v4 = vpop.f32.mrf.mxu0 }
  0xd3   :  { %v195_v6 = vadd.f32 %v693_v4, %v911_v53  ;;  %722 = vmatprep.mubr.msk.bf16.mxu1 %vm365_vm1, %v326_v2  ;;  %v298_v12 = vmax.f32 %v184_v5, 0.0 }
  0xd4   :  { %v186_v8 = vpop.f32.mrf.mxu0  ;;  %723 = vmatmul.mubr.msk.bf16.vlgmr.msra.gmra.mxu1 %vm365_vm1, %v327_v3 }
  0xd5   :  { %v187_v9 = vadd.f32 %v911_v53, %v186_v8  ;;  %v301_v10 = vmax.f32 %v195_v6, 0.0 }
  0xd6   :  { %v696_v11 = vpop.f32.mrf.mxu0 }
  0xd7   :  { %v299_v13 = vmax.f32 %v187_v9, 0.0  ;;  %v329_v17 = vpack.c.bf16 %v301_v10, %v300_v14  ;;  %v208_v21 = vadd.f32 %v696_v11, %v911_v53 }
  0xd8   :  { %v199_v15 = vpop.f32.mrf.mxu0 }
  0xd9   :  { %v328_v16 = vpack.c.bf16 %v299_v13, %v298_v12  ;;  %v200_v19 = vadd.f32 %v911_v53, %v199_v15  ;;  %v304_v28 = vmax.f32 %v208_v21, 0.0 }
  0xda   :  { %v697_v18 = vpop.f32.mrf.mxu0 }
  0xdb   :  { %v211_v20 = vadd.f32 %v697_v18, %v911_v53  ;;  %726 = vmatprep.mubr.msk.bf16.mxu1 %vm365_vm1, %v328_v16  ;;  %v302_v26 = vmax.f32 %v200_v19, 0.0 }
  0xdc   :  { %v202_v22 = vpop.f32.mrf.mxu0  ;;  %727 = vmatmul.mubr.msk.bf16.gmra.mxu1 %vm365_vm1, %v329_v17 }
  0xdd   :  { %v203_v23 = vadd.f32 %v911_v53, %v202_v22  ;;  %v305_v24 = vmax.f32 %v211_v20, 0.0 }
  0xde   :  { %v700_v25 = vpop.f32.mrf.mxu0 }
  0xdf   :  { %v303_v27 = vmax.f32 %v203_v23, 0.0  ;;  %v331_v31 = vpack.c.bf16 %v305_v24, %v304_v28  ;;  %v224_v35 = vadd.f32 %v700_v25, %v911_v53 }
  0xe0   :  { %v215_v29 = vpop.f32.mrf.mxu0 }
  0xe1   :  { %v330_v30 = vpack.c.bf16 %v303_v27, %v302_v26  ;;  %v216_v33 = vadd.f32 %v911_v53, %v215_v29  ;;  %v308_v42 = vmax.f32 %v224_v35, 0.0 }
  0xe2   :  { %v701_v32 = vpop.f32.mrf.mxu0 }
  0xe3   :  { %v227_v34 = vadd.f32 %v701_v32, %v911_v53  ;;  %730 = vmatprep.mubr.msk.bf16.mxu1 %vm365_vm1, %v330_v30  ;;  %v306_v40 = vmax.f32 %v216_v33, 0.0 }
  0xe4   :  { %v218_v36 = vpop.f32.mrf.mxu0  ;;  %731 = vmatmul.mubr.msk.bf16.gmra.mxu1 %vm365_vm1, %v331_v31 }
  0xe5   :  { %v219_v37 = vadd.f32 %v911_v53, %v218_v36  ;;  %v309_v38 = vmax.f32 %v227_v34, 0.0 }
  0xe6   :  { %v704_v39 = vpop.f32.mrf.mxu0 }
  0xe7   :  { %v307_v41 = vmax.f32 %v219_v37, 0.0  ;;  %v333_v45 = vpack.c.bf16 %v309_v38, %v308_v42  ;;  %v240_v49 = vadd.f32 %v704_v39, %v911_v53  ;;  %v964_v37 = vld [vmem:[%s1130_s4] ss:$0 sm:$0xff] }
  0xe8   :  { %v231_v43 = vpop.f32.mrf.mxu0 }
  0xe9   :  { %v332_v44 = vpack.c.bf16 %v307_v41, %v306_v40  ;;  %v232_v47 = vadd.f32 %v911_v53, %v231_v43  ;;  %v312_v57 = vmax.f32 %v240_v49, 0.0 }
  0xea   :  { %v705_v46 = vpop.f32.mrf.mxu0 }
  0xeb   :  { %v243_v48 = vadd.f32 %v705_v46, %v911_v53  ;;  %734 = vmatprep.mubr.msk.bf16.mxu1 %vm365_vm1, %v332_v44  ;;  %v310_v55 = vmax.f32 %v232_v47, 0.0 }
  0xec   :  { %v234_v50 = vpop.f32.mrf.mxu0  ;;  %735 = vmatmul.mubr.msk.bf16.gmra.mxu1 %vm365_vm1, %v333_v45 }
  0xed   :  { %v235_v51 = vadd.f32 %v911_v53, %v234_v50  ;;  %v313_v52 = vmax.f32 %v243_v48, 0.0 }
  0xee   :  { %v708_v54 = vpop.f32.mrf.mxu0 }
  0xef   :  { %v311_v56 = vmax.f32 %v235_v51, 0.0  ;;  %v335_v60 = vpack.c.bf16 %v313_v52, %v312_v57  ;;  %v256_v0 = vadd.f32 %v708_v54, %v911_v53 }
  0xf0   :  { %v247_v58 = vpop.f32.mrf.mxu0 }
  0xf1   :  { %v334_v59 = vpack.c.bf16 %v311_v56, %v310_v55  ;;  %v248_v62 = vadd.f32 %v911_v53, %v247_v58  ;;  %v316_v7 = vmax.f32 %v256_v0, 0.0 }
  0xf2   :  { %v709_v61 = vpop.f32.mrf.mxu0 }
  0xf3   :  { %v259_v63 = vadd.f32 %v709_v61, %v911_v53  ;;  %738 = vmatprep.mubr.msk.bf16.mxu1 %vm365_vm1, %v334_v59  ;;  %v314_v5 = vmax.f32 %v248_v62, 0.0 }
  0xf4   :  { %v250_v1 = vpop.f32.mrf.mxu0  ;;  %739 = vmatmul.mubr.msk.bf16.gmra.mxu1 %vm365_vm1, %v335_v60 }
  0xf5   :  { %v251_v2 = vadd.f32 %v911_v53, %v250_v1  ;;  %v317_v3 = vmax.f32 %v259_v63, 0.0 }
  0xf6   :  { %v712_v4 = vpop.f32.mrf.mxu0 }
  0xf7   :  { %v315_v6 = vmax.f32 %v251_v2, 0.0  ;;  %v337_v10 = vpack.c.bf16 %v317_v3, %v316_v7  ;;  %v272_v14 = vadd.f32 %v712_v4, %v911_v53 }
  0xf8   :  { %v263_v8 = vpop.f32.mrf.mxu0 }
  0xf9   :  { %v336_v9 = vpack.c.bf16 %v315_v6, %v314_v5  ;;  %v264_v12 = vadd.f32 %v911_v53, %v263_v8  ;;  %v320_v21 = vmax.f32 %v272_v14, 0.0 }
  0xfa   :  { %v713_v11 = vpop.f32.mrf.mxu0 }
  0xfb   :  { %v275_v13 = vadd.f32 %v713_v11, %v911_v53  ;;  %742 = vmatprep.mubr.msk.bf16.mxu1 %vm365_vm1, %v336_v9  ;;  %v318_v19 = vmax.f32 %v264_v12, 0.0 }
  0xfc   :  { %v266_v15 = vpop.f32.mrf.mxu0  ;;  %743 = vmatmul.mubr.msk.bf16.gmra.mxu1 %vm365_vm1, %v337_v10 }
  0xfd   :  { %v267_v16 = vadd.f32 %v911_v53, %v266_v15  ;;  %v321_v17 = vmax.f32 %v275_v13, 0.0 }
  0xfe   :  { %v716_v18 = vpop.f32.mrf.mxu0 }
  0xff   :  { %v319_v20 = vmax.f32 %v267_v16, 0.0  ;;  %v339_v24 = vpack.c.bf16 %v321_v17, %v320_v21  ;;  %v288_v28 = vadd.f32 %v716_v18, %v911_v53 }
 0x100   :  { %v279_v22 = vpop.f32.mrf.mxu0 }
 0x101   :  { %v338_v23 = vpack.c.bf16 %v319_v20, %v318_v19  ;;  %v280_v26 = vadd.f32 %v911_v53, %v279_v22  ;;  %v324_v34 = vmax.f32 %v288_v28, 0.0 }
 0x102   :  { %v717_v25 = vpop.f32.mrf.mxu0 }
 0x103   :  { %v291_v27 = vadd.f32 %v717_v25, %v911_v53  ;;  %746 = vmatprep.mubr.msk.bf16.mxu1 %vm365_vm1, %v338_v23  ;;  %v322_v32 = vmax.f32 %v280_v26, 0.0 }
 0x104   :  { %v282_v29 = vpop.f32.mrf.mxu0  ;;  %747 = vmatmul.mubr.msk.bf16.gmra.mxu1 %vm365_vm1, %v339_v24 }
 0x105   :  { %v283_v30 = vadd.f32 %v911_v53, %v282_v29  ;;  %v325_v31 = vmax.f32 %v291_v27, 0.0 }
 0x107   :  { %v323_v33 = vmax.f32 %v283_v30, 0.0  ;;  %v341_v36 = vpack.c.bf16 %v325_v31, %v324_v34 }
 0x109   :  { %v340_v35 = vpack.c.bf16 %v323_v33, %v322_v32 }
 0x10b   :  { %750 = vmatprep.mubr.msk.bf16.mxu1 %vm365_vm1, %v340_v35 }
 0x10c   :  { %751 = vmatmul.mubr.msk.bf16.gmra.mxu1 %vm365_vm1, %v341_v36 }
 0x194   :  { %v724_v38 = vpop.f32.mrf.mxu1 }
 0x195   :  { %v457_v39 = vadd.f32 %v724_v38, %v964_v37 }
 0x196   :  { %v448_v53 = vpop.f32.mrf.mxu1 }
 0x197   :  { %578 = vst.msk [vmem:[%s1131_s5 + $0x10] sm:$0xff] %vm575_vm2, %v457_v39  ;;  %v449_v40 = vadd.f32 %v964_v37, %v448_v53 }
 0x198   :  { %v725_v41 = vpop.f32.mrf.mxu1 }
 0x199   :  { %576 = vst.msk [vmem:[%s1131_s5] sm:$0xff] %vm575_vm2, %v449_v40  ;;  %v460_v42 = vadd.f32 %v725_v41, %v964_v37 }
 0x19a   :  { %v451_v43 = vpop.f32.mrf.mxu1 }
 0x19b   :  { %579 = vst.msk [vmem:[%s1131_s5 + $0x18] sm:$0xff] %vm575_vm2, %v460_v42  ;;  %v452_v44 = vadd.f32 %v964_v37, %v451_v43 }
 0x19c   :  { %v728_v45 = vpop.f32.mrf.mxu1 }
 0x19d   :  { %577 = vst.msk [vmem:[%s1131_s5 + $0x8] sm:$0xff] %vm575_vm2, %v452_v44  ;;  %v473_v46 = vadd.f32 %v728_v45, %v964_v37 }
 0x19e   :  { %v464_v47 = vpop.f32.mrf.mxu1 }
 0x19f   :  { %582 = vst.msk [vmem:[%s1131_s5 + $0x30] sm:$0xff] %vm575_vm2, %v473_v46  ;;  %v465_v48 = vadd.f32 %v964_v37, %v464_v47 }
 0x1a0   :  { %v729_v49 = vpop.f32.mrf.mxu1 }
 0x1a1   :  { %580 = vst.msk [vmem:[%s1131_s5 + $0x20] sm:$0xff] %vm575_vm2, %v465_v48  ;;  %v476_v50 = vadd.f32 %v729_v49, %v964_v37 }
 0x1a2   :  { %v467_v51 = vpop.f32.mrf.mxu1 }
 0x1a3   :  { %583 = vst.msk [vmem:[%s1131_s5 + $0x38] sm:$0xff] %vm575_vm2, %v476_v50  ;;  %v468_v52 = vadd.f32 %v964_v37, %v467_v51 }
 0x1a4   :  { %v732_v54 = vpop.f32.mrf.mxu1 }
 0x1a5   :  { %581 = vst.msk [vmem:[%s1131_s5 + $0x28] sm:$0xff] %vm575_vm2, %v468_v52  ;;  %v489_v55 = vadd.f32 %v732_v54, %v964_v37 }
 0x1a6   :  { %v480_v56 = vpop.f32.mrf.mxu1 }
 0x1a7   :  { %586 = vst.msk [vmem:[%s1131_s5 + $0x50] sm:$0xff] %vm575_vm2, %v489_v55  ;;  %v481_v57 = vadd.f32 %v964_v37, %v480_v56 }
 0x1a8   :  { %v733_v58 = vpop.f32.mrf.mxu1 }
 0x1a9   :  { %584 = vst.msk [vmem:[%s1131_s5 + $0x40] sm:$0xff] %vm575_vm2, %v481_v57  ;;  %v492_v59 = vadd.f32 %v733_v58, %v964_v37 }
 0x1aa   :  { %v483_v60 = vpop.f32.mrf.mxu1 }
 0x1ab   :  { %587 = vst.msk [vmem:[%s1131_s5 + $0x58] sm:$0xff] %vm575_vm2, %v492_v59  ;;  %v484_v61 = vadd.f32 %v964_v37, %v483_v60 }
 0x1ac   :  { %v736_v62 = vpop.f32.mrf.mxu1 }
 0x1ad   :  { %585 = vst.msk [vmem:[%s1131_s5 + $0x48] sm:$0xff] %vm575_vm2, %v484_v61  ;;  %v505_v63 = vadd.f32 %v736_v62, %v964_v37 }
 0x1ae   :  { %v496_v0 = vpop.f32.mrf.mxu1 }
 0x1af   :  { %590 = vst.msk [vmem:[%s1131_s5 + $0x70] sm:$0xff] %vm575_vm2, %v505_v63  ;;  %v497_v1 = vadd.f32 %v964_v37, %v496_v0 }
 0x1b0   :  { %v737_v2 = vpop.f32.mrf.mxu1 }
 0x1b1   :  { %588 = vst.msk [vmem:[%s1131_s5 + $0x60] sm:$0xff] %vm575_vm2, %v497_v1  ;;  %v508_v3 = vadd.f32 %v737_v2, %v964_v37 }
 0x1b2   :  { %v499_v4 = vpop.f32.mrf.mxu1 }
 0x1b3   :  { %591 = vst.msk [vmem:[%s1131_s5 + $0x78] sm:$0xff] %vm575_vm2, %v508_v3  ;;  %v500_v5 = vadd.f32 %v964_v37, %v499_v4 }
 0x1b4   :  { %v740_v6 = vpop.f32.mrf.mxu1 }
 0x1b5   :  { %589 = vst.msk [vmem:[%s1131_s5 + $0x68] sm:$0xff] %vm575_vm2, %v500_v5  ;;  %v521_v7 = vadd.f32 %v740_v6, %v964_v37 }
 0x1b6   :  { %v512_v8 = vpop.f32.mrf.mxu1 }
 0x1b7   :  { %594 = vst.msk [vmem:[%s1131_s5 + $0x90] sm:$0xff] %vm575_vm2, %v521_v7  ;;  %v513_v9 = vadd.f32 %v964_v37, %v512_v8 }
 0x1b8   :  { %v741_v10 = vpop.f32.mrf.mxu1 }
 0x1b9   :  { %592 = vst.msk [vmem:[%s1131_s5 + $0x80] sm:$0xff] %vm575_vm2, %v513_v9  ;;  %v524_v11 = vadd.f32 %v741_v10, %v964_v37 }
 0x1ba   :  { %v515_v12 = vpop.f32.mrf.mxu1 }
 0x1bb   :  { %595 = vst.msk [vmem:[%s1131_s5 + $0x98] sm:$0xff] %vm575_vm2, %v524_v11  ;;  %v516_v13 = vadd.f32 %v964_v37, %v515_v12 }
 0x1bc   :  { %v744_v14 = vpop.f32.mrf.mxu1 }
 0x1bd   :  { %593 = vst.msk [vmem:[%s1131_s5 + $0x88] sm:$0xff] %vm575_vm2, %v516_v13  ;;  %v537_v15 = vadd.f32 %v744_v14, %v964_v37 }
 0x1be   :  { %v528_v16 = vpop.f32.mrf.mxu1 }
 0x1bf   :  { %598 = vst.msk [vmem:[%s1131_s5 + $0xb0] sm:$0xff] %vm575_vm2, %v537_v15  ;;  %v529_v17 = vadd.f32 %v964_v37, %v528_v16 }
 0x1c0   :  { %v745_v18 = vpop.f32.mrf.mxu1 }
 0x1c1   :  { %596 = vst.msk [vmem:[%s1131_s5 + $0xa0] sm:$0xff] %vm575_vm2, %v529_v17  ;;  %v540_v19 = vadd.f32 %v745_v18, %v964_v37 }
 0x1c2   :  { %v531_v20 = vpop.f32.mrf.mxu1 }
 0x1c3   :  { %599 = vst.msk [vmem:[%s1131_s5 + $0xb8] sm:$0xff] %vm575_vm2, %v540_v19  ;;  %v532_v21 = vadd.f32 %v964_v37, %v531_v20 }
 0x1c4   :  { %v748_v22 = vpop.f32.mrf.mxu1 }
 0x1c5   :  { %597 = vst.msk [vmem:[%s1131_s5 + $0xa8] sm:$0xff] %vm575_vm2, %v532_v21  ;;  %v553_v23 = vadd.f32 %v748_v22, %v964_v37 }
 0x1c6   :  { %v544_v24 = vpop.f32.mrf.mxu1 }
 0x1c7   :  { %602 = vst.msk [vmem:[%s1131_s5 + $0xd0] sm:$0xff] %vm575_vm2, %v553_v23  ;;  %v545_v25 = vadd.f32 %v964_v37, %v544_v24 }
 0x1c8   :  { %v749_v26 = vpop.f32.mrf.mxu1 }
 0x1c9   :  { %600 = vst.msk [vmem:[%s1131_s5 + $0xc0] sm:$0xff] %vm575_vm2, %v545_v25  ;;  %v556_v27 = vadd.f32 %v749_v26, %v964_v37 }
 0x1ca   :  { %v547_v28 = vpop.f32.mrf.mxu1 }
 0x1cb   :  { %603 = vst.msk [vmem:[%s1131_s5 + $0xd8] sm:$0xff] %vm575_vm2, %v556_v27  ;;  %v548_v29 = vadd.f32 %v964_v37, %v547_v28 }
 0x1cc   :  { %v752_v30 = vpop.f32.mrf.mxu1 }
 0x1cd   :  { %601 = vst.msk [vmem:[%s1131_s5 + $0xc8] sm:$0xff] %vm575_vm2, %v548_v29  ;;  %v569_v31 = vadd.f32 %v752_v30, %v964_v37 }
 0x1ce   :  { %v560_v32 = vpop.f32.mrf.mxu1 }
 0x1cf   :  { %606 = vst.msk [vmem:[%s1131_s5 + $0xf0] sm:$0xff] %vm575_vm2, %v569_v31  ;;  %v561_v33 = vadd.f32 %v964_v37, %v560_v32 }
 0x1d0   :  { %v753_v34 = vpop.f32.mrf.mxu1 }
 0x1d1   :  { %604 = vst.msk [vmem:[%s1131_s5 + $0xe0] sm:$0xff] %vm575_vm2, %v561_v33  ;;  %v572_v35 = vadd.f32 %v753_v34, %v964_v37 }
 0x1d2   :  { %v563_v36 = vpop.f32.mrf.mxu1 }
 0x1d3   :  { %607 = vst.msk [vmem:[%s1131_s5 + $0xf8] sm:$0xff] %vm575_vm2, %v572_v35  ;;  %v564_v38 = vadd.f32 %v964_v37, %v563_v36 }
 0x1d5   :  { %605 = vst.msk [vmem:[%s1131_s5 + $0xe8] sm:$0xff] %vm575_vm2, %v564_v38 }

</bundles_post_ra>
